<compile_context>
chip_gen: v6e
topology: v6e:2x2x1
jax: 0.10.0
libtpu: 0.0.40
codegen_flags: <defaults>
</compile_context>

<pallas_src>
import numpy as np
import jax
import jax.numpy as jnp
from jax import lax
from jax.experimental import pallas as pl
from jax.experimental.pallas import tpu as pltpu


def _make_kernel(t_rows, valid_last, ragged, pack):
    """Builds the row-tile kernel with all shape decisions baked in statically."""

    def kernel(mask_ref, umsq_ref, recon_ref, target_ref, e_ref, r_ref, acc_ref):
        # Zero the VMEM-resident accumulator on the first grid step only.
        @pl.when(pl.program_id(0) == 0)
        def _init():
            acc_ref[...] = jnp.zeros_like(acc_ref)

        diff = recon_ref[...].astype(jnp.float32) - target_ref[...].astype(jnp.float32)

        # Per-element weight  mask[row, m(col)] / dim(m(col)) * umask[row]^2  built on
        # the MXU: one matmul with the block-diagonal expansion matrix E (modality
        # selector * 1/dim) and one with the lane-group replication matrix R (umask^2).
        # No iota / nested-where chains on the VPU.
        w = jnp.dot(mask_ref[...], e_ref[...], preferred_element_type=jnp.float32)
        if pack > 1:
            w = w * jnp.dot(umsq_ref[...], r_ref[...], preferred_element_type=jnp.float32)
        else:
            w = w * umsq_ref[...]  # (t, 1) lane-broadcast; r_ref unused in this case.

        contrib = diff * diff * w

        if ragged:
            # The last grid step only partially overlaps the arrays; rows past the end
            # hold unspecified data, so zero their contribution explicitly (zero weights
            # alone are not enough: 0 * garbage-NaN would still be NaN).
            is_last = pl.program_id(0) == pl.num_programs(0) - 1
            limit = jnp.where(is_last, valid_last, t_rows)
            rows = lax.broadcasted_iota(jnp.int32, (t_rows, 1), 0)
            contrib = jnp.where(rows < limit, contrib, 0.0)

        # Sublane reduce feeds the resident (1, cols) vector accumulator; the final
        # tiny cross-lane reduce + normalization happens once outside the kernel.
        acc_ref[...] += jnp.sum(contrib, axis=0, keepdims=True)

    return kernel


def masked_recon_loss(recon_input, target_input, input_mask, umask,
                      adim, tdim, vdim, tile_packed_rows=4096):
    """JAX/Pallas equivalent of MaskedReconLoss.forward.

    recon_input / target_input : lists of length 1 with [seqlen, batch, dim]
    input_mask                 : list of length 1 with [seqlen, batch, >=3]
    umask                      : [batch, seqlen]
    """
    assert len(recon_input) == 1
    recon = recon_input[0]
    target = target_input[0]
    mask = input_mask[0]

    s, b, d = recon.shape
    assert d == adim + tdim + vdim
    n = s * b

    recon2 = jnp.reshape(recon, (n, d))                       # free (row-major)
    target2 = jnp.reshape(target, (n, d))                     # free (row-major)
    mask2 = jnp.reshape(mask, (n, mask.shape[2]))[:, :3].astype(jnp.float32)
    # umask.permute(1, 0).reshape(-1): seqlen-major, matching the flattened rows.
    um = jnp.reshape(jnp.transpose(umask, (1, 0)).astype(jnp.float32), (n,))
    umsq = um * um
    denom = jnp.sum(um)

    # Compile-time per-column modality selector / 1-over-dim scale rows.
    scale_np = np.zeros((3, d), dtype=np.float32)
    scale_np[0, :adim] = 1.0 / adim
    scale_np[1, adim:adim + tdim] = 1.0 / tdim
    scale_np[2, adim + tdim:] = 1.0 / vdim
    scale_arr = jnp.asarray(scale_np)

    # Lane-dense packing: pack consecutive original rows per 128-lane packed row.
    pack = 128 // d if (d <= 128 and 128 % d == 0) else 1
    cols = pack * d
    n_main = (n // pack) * pack          # rows handled by the kernel
    packed = n_main // pack              # packed (128-lane) rows
    tail = n - n_main                    # 0 .. pack-1 leftover rows (plain JAX)

    numer = jnp.zeros((), jnp.float32)

    if packed >= 8:
        # Tile size: biggest that keeps the double-buffered recon/target streams
        # within ~8 MiB of VMEM (safe under v5e/v6e/v7x default scoped limits).
        t_budget = max(8, ((8 * 1024 * 1024) // (16 * cols)) // 8 * 8)
        t_rows = min(int(tile_packed_rows) // 8 * 8, t_budget, packed // 8 * 8)
        t_rows = max(t_rows, 8)
        grid = (pl.cdiv(packed, t_rows),)
        rem = packed % t_rows
        ragged = rem != 0
        valid_last = rem if ragged else t_rows

        # Constant weight-construction matrices:
        #   E[3q + m, q*d + c] = scale[m, c]   (modality selector * 1/dim)
        #   R[q,     q*d + c] = 1              (replicates umask^2 over its lane group)
        e_np = np.zeros((3 * pack, cols), dtype=np.float32)
        r_np = np.zeros((pack, cols), dtype=np.float32)
        for q in range(pack):
            e_np[3 * q:3 * q + 3, q * d:(q + 1) * d] = scale_np
            r_np[q, q * d:(q + 1) * d] = 1.0
        e_arr = jnp.asarray(e_np)
        r_arr = jnp.asarray(r_np)

        # Free row-major reshapes into lane-dense layout (no pad copies).
        mask_ld = jnp.reshape(mask2[:n_main], (packed, 3 * pack))
        umsq_ld = jnp.reshape(umsq[:n_main], (packed, pack))
        recon_ld = jnp.reshape(recon2[:n_main], (packed, cols))
        target_ld = jnp.reshape(target2[:n_main], (packed, cols))

        kernel = _make_kernel(t_rows, valid_last, ragged, pack)
        acc = pl.pallas_call(
            kernel,
            out_shape=jax.ShapeDtypeStruct((1, cols), jnp.float32),
            grid=grid,
            in_specs=[
                pl.BlockSpec((t_rows, 3 * pack), lambda i: (i, 0)),
                pl.BlockSpec((t_rows, pack), lambda i: (i, 0)),
                pl.BlockSpec((t_rows, cols), lambda i: (i, 0)),
                pl.BlockSpec((t_rows, cols), lambda i: (i, 0)),
                pl.BlockSpec((3 * pack, cols), lambda i: (0, 0)),   # constant, resident
                pl.BlockSpec((pack, cols), lambda i: (0, 0)),       # constant, resident
            ],
            out_specs=pl.BlockSpec((1, cols), lambda i: (0, 0)),    # resident accumulator
            compiler_params=pltpu.CompilerParams(
                dimension_semantics=("arbitrary",)),
        )(mask_ld, umsq_ld, recon_ld, target_ld, e_arr, r_arr)
        numer = jnp.sum(acc)
    else:
        # Fewer than 8 packed rows: a kernel launch is not worth it; fold everything
        # into the tiny plain-JAX path below (same math).
        n_main, tail = 0, n

    if tail > 0:
        diff_t = recon2[n_main:].astype(jnp.float32) - target2[n_main:].astype(jnp.float32)
        w_t = (mask2[n_main:] * umsq[n_main:, None]) @ scale_arr
        numer = numer + jnp.sum(diff_t * diff_t * w_t)

    # Matches PyTorch: may produce inf/nan if umask sums to zero, same as the module.
    return numer / denom


def _reference(recon_input, target_input, input_mask, umask, adim, tdim, vdim):
    """Pure-JAX port of the PyTorch forward, for verification."""
    recon = jnp.reshape(recon_input[0], (-1, recon_input[0].shape[2])).astype(jnp.float32)
    target = jnp.reshape(target_input[0], (-1, target_input[0].shape[2])).astype(jnp.float32)
    mask = jnp.reshape(input_mask[0], (-1, input_mask[0].shape[2])).astype(jnp.float32)
    um = jnp.reshape(jnp.transpose(umask, (1, 0)).astype(jnp.float32), (-1, 1))
    A_rec, L_rec, V_rec = recon[:, :adim], recon[:, adim:adim + tdim], recon[:, adim + tdim:]
    A_full, L_full, V_full = target[:, :adim], target[:, adim:adim + tdim], target[:, adim + tdim:]
    A_mi = jnp.reshape(mask[:, 0], (-1, 1))
    L_mi = jnp.reshape(mask[:, 1], (-1, 1))
    V_mi = jnp.reshape(mask[:, 2], (-1, 1))
    l1 = jnp.sum(((A_rec * um - A_full * um) ** 2) * A_mi) / adim
    l2 = jnp.sum(((L_rec * um - L_full * um) ** 2) * L_mi) / tdim
    l3 = jnp.sum(((V_rec * um - V_full * um) ** 2) * V_mi) / vdim
    return (l1 + l2 + l3) / jnp.sum(um)


if __name__ == "__main__":
    key = jax.random.PRNGKey(0)

    def run_case(case_key, seqlen, batch, adim, tdim, vdim, **kw):
        d = adim + tdim + vdim
        k1, k2, k3, k4 = jax.random.split(case_key, 4)
        recon = jax.random.normal(k1, (seqlen, batch, d), dtype=jnp.float32)
        target = jax.random.normal(k2, (seqlen, batch, d), dtype=jnp.float32)
        miss = jax.random.bernoulli(k3, 0.7, (seqlen, batch, 3)).astype(jnp.float32)
        umask = jax.random.bernoulli(k4, 0.9, (batch, seqlen)).astype(jnp.float32)
        loss = masked_recon_loss([recon], [target], [miss], umask, adim, tdim, vdim, **kw)
        loss = jax.block_until_ready(loss)
        ref = _reference([recon], [target], [miss], umask, adim, tdim, vdim)
        assert jnp.allclose(loss, ref, rtol=1e-4, atol=1e-5), (seqlen, batch, loss, ref)
        return loss

    keys = jax.random.split(key, 3)
    # Single full tile, one grid step (n = 128, aligned: zero-copy streaming).
    run_case(keys[0], seqlen=16, batch=8, adim=6, tdim=5, vdim=5)
    # Ragged last tile + leftover (n % pack) rows handled in plain JAX (n = 81).
    run_case(keys[1], seqlen=27, batch=3, adim=6, tdim=5, vdim=5)
    # Multi-step grid accumulation (force a small tile so grid = 2).
    run_case(keys[2], seqlen=64, batch=2, adim=6, tdim=5, vdim=5, tile_packed_rows=8)

    print("KERNEL_OK")
</pallas_src>

<mosaic_0001>
module attributes {stable_mosaic.version = 11 : i64} {
  func.func @kernel(%arg0: i32, %arg1: memref<16x24xf32, #tpu.memory_space<vmem>>, %arg2: memref<16x8xf32, #tpu.memory_space<vmem>>, %arg3: memref<16x128xf32, #tpu.memory_space<vmem>>, %arg4: memref<16x128xf32, #tpu.memory_space<vmem>>, %arg5: memref<24x128xf32, #tpu.memory_space<vmem>>, %arg6: memref<8x128xf32, #tpu.memory_space<vmem>>, %arg7: memref<1x128xf32, #tpu.memory_space<vmem>>) attributes {dimension_semantics = [#tpu.dimension_semantics<arbitrary>], iteration_bounds = array<i64: 1>, scalar_prefetch = 0 : i64, scratch_operands = 0 : i64, tpu.core_type = #tpu.core_type<tc>, window_params = [{transform_indices = @transform_0, window_bounds = array<i64: 16, 24>}, {transform_indices = @transform_1, window_bounds = array<i64: 16, 8>}, {transform_indices = @transform_2, window_bounds = array<i64: 16, 128>}, {transform_indices = @transform_3, window_bounds = array<i64: 16, 128>}, {pipeline_mode = #tpu.pipeline_mode<synchronous>, transform_indices = @transform_4, window_bounds = array<i64: 24, 128>}, {pipeline_mode = #tpu.pipeline_mode<synchronous>, transform_indices = @transform_5, window_bounds = array<i64: 8, 128>}, {pipeline_mode = #tpu.pipeline_mode<synchronous>, transform_indices = @transform_6, window_bounds = array<i64: 1, 128>}]} {
    %c0_i32 = arith.constant 0 : i32
    %0 = arith.cmpi eq, %arg0, %c0_i32 : i32
    %1 = arith.extui %0 : i1 to i32
    %c0_i32_0 = arith.constant 0 : i32
    %2 = arith.cmpi ne, %1, %c0_i32_0 : i32
    scf.if %2 {
      %cst_18 = arith.constant 0.000000e+00 : f32
      %20 = vector.broadcast %cst_18 : f32 to vector<1x128xf32>
      %c0_19 = arith.constant 0 : index
      %c0_20 = arith.constant 0 : index
      %21 = vector.load %arg7[%c0_19, %c0_20] : memref<1x128xf32, #tpu.memory_space<vmem>>, vector<1x128xf32>
      tpu.vector_store %arg7[%c0_19, %c0_20], %20 {strides = array<i32>} : memref<1x128xf32, #tpu.memory_space<vmem>>, vector<1x128xf32>,
    } else {
    }
    %c0 = arith.constant 0 : index
    %c0_1 = arith.constant 0 : index
    %3 = vector.load %arg3[%c0, %c0_1] : memref<16x128xf32, #tpu.memory_space<vmem>>, vector<16x128xf32>
    %c0_2 = arith.constant 0 : index
    %c0_3 = arith.constant 0 : index
    %4 = vector.load %arg4[%c0_2, %c0_3] : memref<16x128xf32, #tpu.memory_space<vmem>>, vector<16x128xf32>
    %5 = arith.subf %3, %4 : vector<16x128xf32>
    %c0_4 = arith.constant 0 : index
    %c0_5 = arith.constant 0 : index
    %6 = vector.load %arg1[%c0_4, %c0_5] : memref<16x24xf32, #tpu.memory_space<vmem>>, vector<16x24xf32>
    %c0_6 = arith.constant 0 : index
    %c0_7 = arith.constant 0 : index
    %7 = vector.load %arg5[%c0_6, %c0_7] : memref<24x128xf32, #tpu.memory_space<vmem>>, vector<24x128xf32>
    %cst = arith.constant dense<0.000000e+00> : vector<16x128xf32>
    %8 = tpu.matmul %6, %7, %cst {dimension_numbers = #tpu.dot_dimension_numbers<[1], [0], [0], [1], [0, 0, 1, 1], [], []>} : vector<16x24xf32>, vector<24x128xf32>, vector<16x128xf32> -> vector<16x128xf32>
    %c0_8 = arith.constant 0 : index
    %c0_9 = arith.constant 0 : index
    %9 = vector.load %arg2[%c0_8, %c0_9] : memref<16x8xf32, #tpu.memory_space<vmem>>, vector<16x8xf32>
    %c0_10 = arith.constant 0 : index
    %c0_11 = arith.constant 0 : index
    %10 = vector.load %arg6[%c0_10, %c0_11] : memref<8x128xf32, #tpu.memory_space<vmem>>, vector<8x128xf32>
    %cst_12 = arith.constant dense<0.000000e+00> : vector<16x128xf32>
    %11 = tpu.matmul %9, %10, %cst_12 {dimension_numbers = #tpu.dot_dimension_numbers<[1], [0], [0], [1], [0, 0, 1, 1], [], []>} : vector<16x8xf32>, vector<8x128xf32>, vector<16x128xf32> -> vector<16x128xf32>
    %12 = arith.mulf %8, %11 : vector<16x128xf32>
    %13 = arith.mulf %5, %5 : vector<16x128xf32>
    %14 = arith.mulf %13, %12 : vector<16x128xf32>
    %c0_13 = arith.constant 0 : index
    %c0_14 = arith.constant 0 : index
    %15 = vector.load %arg7[%c0_13, %c0_14] : memref<1x128xf32, #tpu.memory_space<vmem>>, vector<1x128xf32>
    %cst_15 = arith.constant dense<0.000000e+00> : vector<128xf32>
    %16 = vector.multi_reduction <add>, %14, %cst_15 [0] : vector<16x128xf32> to vector<128xf32>
    %17 = vector.shape_cast %16 : vector<128xf32> to vector<1x128xf32>
    %18 = arith.addf %15, %17 : vector<1x128xf32>
    %c0_16 = arith.constant 0 : index
    %c0_17 = arith.constant 0 : index
    %19 = vector.load %arg7[%c0_16, %c0_17] : memref<1x128xf32, #tpu.memory_space<vmem>>, vector<1x128xf32>
    tpu.vector_store %arg7[%c0_16, %c0_17], %18 {strides = array<i32>} : memref<1x128xf32, #tpu.memory_space<vmem>>, vector<1x128xf32>,
    return
  }
  func.func @transform_0(%arg0: i32) -> (i32, i32) {
    %c0_i32 = arith.constant 0 : i32
    %c0_i32_0 = arith.constant 0 : i32
    return %arg0, %c0_i32 : i32, i32
  }
  func.func @transform_1(%arg0: i32) -> (i32, i32) {
    %c0_i32 = arith.constant 0 : i32
    %c0_i32_0 = arith.constant 0 : i32
    return %arg0, %c0_i32 : i32, i32
  }
  func.func @transform_2(%arg0: i32) -> (i32, i32) {
    %c0_i32 = arith.constant 0 : i32
    %c0_i32_0 = arith.constant 0 : i32
    return %arg0, %c0_i32 : i32, i32
  }
  func.func @transform_3(%arg0: i32) -> (i32, i32) {
    %c0_i32 = arith.constant 0 : i32
    %c0_i32_0 = arith.constant 0 : i32
    return %arg0, %c0_i32 : i32, i32
  }
  func.func @transform_4(%arg0: i32) -> (i32, i32) {
    %c0_i32 = arith.constant 0 : i32
    %c0_i32_0 = arith.constant 0 : i32
    %c0_i32_1 = arith.constant 0 : i32
    return %c0_i32, %c0_i32_0 : i32, i32
  }
  func.func @transform_5(%arg0: i32) -> (i32, i32) {
    %c0_i32 = arith.constant 0 : i32
    %c0_i32_0 = arith.constant 0 : i32
    %c0_i32_1 = arith.constant 0 : i32
    return %c0_i32, %c0_i32_0 : i32, i32
  }
  func.func @transform_6(%arg0: i32) -> (i32, i32) {
    %c0_i32 = arith.constant 0 : i32
    %c0_i32_0 = arith.constant 0 : i32
    %c0_i32_1 = arith.constant 0 : i32
    return %c0_i32, %c0_i32_0 : i32, i32
  }
}

</mosaic_0001>

<bundles_post_ra>
// kernel: tpu_custom_call.1
= control target key start
LH: loop header
LB: loop body
LE: loop exit
PB: predicated region body
PF: predicated region fallthrough
CT: control target
= control target key end

     0   :  { %11 = vsyncpa [#allocation3], 0  ;;  %s471_s0 = inlined_call_operand.hbm [shape: f32[16,24], index: 0, kind: input, shape index: {}]   ;;  %s472_s1 = inlined_call_operand.vmem [shape: f32[16,8], index: 1, kind: input, shape index: {}]   ;;  %s473_s2 = inlined_call_operand.hbm [shape: f32[16,128], index: 2, kind: input, shape index: {}]   ;;  %s474_s3 = inlined_call_operand.hbm [shape: f32[16,128], index: 3, kind: input, shape index: {}]   ;;  %s475_s4 = inlined_call_operand.vmem [shape: f32[24,128], index: 4, kind: input, shape index: {}]   ;;  %s476_s5 = inlined_call_operand.vmem [shape: f32[8,128], index: 5, kind: input, shape index: {}]   ;;  %s477_s6 = inlined_call_operand.hbm [shape: f32[1,128], index: 6, kind: output, shape index: {}]  }
   0x1   :  { %12 = vsyncpa [#allocation6], 0 }
   0x2   :  { %13 = vsyncpa [#allocation4], 0  ;;  %s399_s21 = smov [#allocation5]   ;;  %s400_s23 = smov [#allocation2]  }
   0x3   :  { %s33_s22 = sshll.u32 %s399_s21, 4  ;;  %s19_s24 = sshll.u32 %s400_s23, 4  ;;  %s34_s22 = int_to_ptr.vmem [resolvable:$true] %s33_s22  ;;  %s20_s24 = int_to_ptr.vmem [resolvable:$true] %s19_s24 }
   0x4   :  { %s321_s25 = scalar_lea.vmem %s34_s22, 256  ;;  %p326_p1 = scmp.lt.s32.totalorder %s34_s22, %s34_s22 }
   0x5   :  { %p322_p0 = scmp.ne.s32.totalorder %s34_s22, %s321_s25  ;;  %p327_p2 = scmp.lt.s32.totalorder %s321_s25, %s321_s25 }
   0x7   :  { %p328_p3 = por %p327_p2, %p326_p1 }
   0x9   :  { %p329_p4 = pnand %p328_p3, %p322_p0 }
   0xb   :  { %332 = shalt.err (!%p329_p4)
}
   0xc   :  { %s401_s26 = smov 128   ;;  %s402_s27 = smov 8  }
   0xd   :  { %39 = dma.hbm_to_vmem [thread:$0]  %s473_s2, 256, %s34_s22, [#allocation6], %s401_s26, %s401_s26, %s402_s27  }
   0xe   :  { %s341_s30 = scalar_lea.vmem %s20_s24, 256  ;;  %p346_p6 = scmp.lt.s32.totalorder %s20_s24, %s20_s24 }
   0xf   :  { %p342_p5 = scmp.ne.s32.totalorder %s20_s24, %s341_s30  ;;  %p347_p7 = scmp.lt.s32.totalorder %s341_s30, %s341_s30 }
  0x11   :  { %p348_p8 = por %p347_p7, %p346_p6 }
  0x13   :  { %p349_p9 = pnand %p348_p8, %p342_p5 }
  0x15   :  { %352 = shalt.err (!%p349_p9)
}
  0x16   :  { %25 = dma.hbm_to_vmem [thread:$0]  %s471_s0, 256, %s20_s24, [#allocation3], %s401_s26, %s401_s26, %s402_s27  }
  0x17   :  { %s403_s9 = smov [#allocation7]  }
  0x18   :  { %s45_s10 = sshll.u32 %s403_s9, 4  ;;  %s46_s10 = int_to_ptr.vmem [resolvable:$true] %s45_s10 }
  0x19   :  { %s361_s11 = scalar_lea.vmem %s46_s10, 256  ;;  %p366_p11 = scmp.lt.s32.totalorder %s46_s10, %s46_s10 }
  0x1a   :  { %p362_p10 = scmp.ne.s32.totalorder %s46_s10, %s361_s11  ;;  %p367_p12 = scmp.lt.s32.totalorder %s361_s11, %s361_s11 }
  0x1c   :  { %p368_p13 = por %p367_p12, %p366_p11 }
  0x1e   :  { %p369_p0 = pnand %p368_p13, %p362_p10 }
  0x20   :  { %372 = shalt.err (!%p369_p0)
}
  0x21   :  { %51 = dma.hbm_to_vmem [thread:$0]  %s474_s3, 256, %s46_s10, [#allocation6], %s401_s26, %s401_s26, %s402_s27  }
  0x22   :  { %393 = dma.done.wait [#allocation3], 256  }
  0x23   :  { %394 = vsyncadd [#allocation3], 4294967040 }
  0x24   :  { %395 = dma.done.wait [#allocation6], 512  }
  0x25   :  { %396 = vsyncadd [#allocation6], 4294966784  ;;  %v80_v0 = vld [vmem:[%s475_s4 + $0x10] sm:$0xff]  ;;  %v79_v1 = vld [vmem:[%s475_s4 + $0x8] sm:$0xff]  ;;  %vm166_vm0 = vcmask 64512   ;;  %vm81_vm1 = vcmask 195584  }
  0x26   :  { %v165_v2 = vld [vmem:[%s476_s5] sm:$0xff]  ;;  %292 = vmatprep.subr.mxu0 %v80_v0  ;;  %v164_v4 = vld [vmem:[%s472_s1 + $0x8] sm:$0xff]  ;;  %v404_v8 = vmov 0.0   ;;  %v71_v9 = vld [vmem:[#allocation5 + $0x8] sm:$0xff] }
  0x27   :  { %301 = vmatprep.subr.mxu1 %v165_v2  ;;  %v163_v3 = vld [vmem:[%s472_s1] sm:$0xff]  ;;  %293 = vmatpush3.msra.mxu0 %v80_v0  ;;  %v77_v7 = vld [vmem:[#allocation2 + $0x8] sm:$0xff]  ;;  %69 = vst [vmem:[#allocation8] sm:$0x1] %v404_v8  ;;  %v70_v11 = vld [vmem:[#allocation5] sm:$0xff]  ;;  %s405_s1 = smov [#allocation8]  }
  0x28   :  { %302 = vmatpush3.msra.mxu1 %v165_v2  ;;  %v78_v5 = vld [vmem:[%s475_s4] sm:$0xff]  ;;  %294 = vmatprep.subr.mxu0 %v79_v1  ;;  %v73_v10 = vld [vmem:[#allocation7 + $0x8] sm:$0xff]  ;;  %s270_s4 = sshll.u32 %s405_s1, 4  ;;  %s271_s4 = int_to_ptr.vmem [resolvable:$true] %s270_s4 }
  0x29   :  { %v76_v6 = vld [vmem:[#allocation2] sm:$0xff]  ;;  %303 = vmatprep.mubr.msk.f32.mxu1 %vm166_vm0, %v163_v3  ;;  %295 = vmatpush3.msra.mxu0 %v79_v1  ;;  %v75_v13 = vsub.f32 %v71_v9, %v73_v10  ;;  %s373_s5 = scalar_lea.vmem %s271_s4, 16  ;;  %s377_s23 = scalar_lea.vmem %s271_s4, 32 }
  0x2a   :  { %304 = vmatmul.mubr.msk.f32.vlgmr.msra.gmra.mxu1 %vm166_vm0, %v164_v4  ;;  %296 = vmatprep.subr.mxu0 %v78_v5  ;;  %v72_v12 = vld [vmem:[#allocation7] sm:$0xff]  ;;  %p374_p1 = scmp.ne.s32.totalorder %s271_s4, %s373_s5  ;;  %p378_p2 = scmp.lt.s32.totalorder %s271_s4, %s271_s4 }
  0x2b   :  { %298 = vmatprep.mubr.msk.f32.mxu0 %vm81_vm1, %v76_v6  ;;  %297 = vmatpush3.msra.mxu0 %v78_v5  ;;  %v74_v14 = vsub.f32 %v70_v11, %v72_v12  ;;  %v251_v18 = vmul.f32 %v75_v13, %v75_v13  ;;  %p379_p3 = scmp.lt.s32.totalorder %s377_s23, %s373_s5 }
  0x2c   :  { %299 = vmatmul.mubr.msk.f32.vlgmr.msra.gmra.mxu0 %vm81_vm1, %v77_v7 }
  0x2d   :  { %v250_v19 = vmul.f32 %v74_v14, %v74_v14  ;;  %p380_p4 = por %p379_p3, %p378_p2 }
  0x2e   :  { %v254_v31 = vld [vmem:[#allocation8] sm:$0x1] }
  0x2f   :  { %p381_p5 = pnand %p380_p4, %p374_p1 }
  0xea   :  { %v305_v15 = vpop.f32.mrf.mxu1 }
  0xec   :  { %v300_v16 = vpop.f32.mrf.mxu0  ;;  %v239_v20 = vpop.f32.mrf.mxu1 }
  0xed   :  { %v249_v17 = vmul.f32 %v305_v15, %v300_v16 }
  0xee   :  { %v154_v21 = vpop.f32.mrf.mxu0 }
  0xef   :  { %v248_v22 = vmul.f32 %v239_v20, %v154_v21  ;;  %v253_v23 = vmul.f32 %v251_v18, %v249_v17 }
  0xf1   :  { %v252_v24 = vmul.f32 %v250_v19, %v248_v22 }
  0xf3   :  { %v255_v25 = vadd.f32 %v253_v23, %v252_v24 }
  0xf5   :  { %v256_v26 = vrot.slane %v255_v25, 4 }
  0xf7   :  { %v257_v27 = vadd.f32 %v256_v26, %v255_v25 }
  0xf9   :  { %v258_v28 = vrot.slane %v257_v27, 2 }
  0xfb   :  { %v259_v29 = vadd.f32 %v258_v28, %v257_v27 }
  0xfd   :  { %v260_v30 = vrot.slane %v259_v29, 1 }
  0xff   :  { %v261_v32 = vadd.f32 %v260_v30, %v259_v29 }
 0x101   :  { %v262_v33 = vadd.f32 %v261_v32, %v254_v31 }
 0x103   :  { %263 = vst [vmem:[#allocation8] sm:$0x1] %v262_v33 }
 0x104   :  { %384 = shalt.err (!%p381_p5)
}
 0x105   :  { %273 = dma.vmem_to_hbm [thread:$0]  %s271_s4, 16, %s477_s6, [#allocation4]  }
 0x106   :  { %397 = dma.done.wait [#allocation4], 16  }
 0x107   :  { %398 = vsyncadd [#allocation4], 4294967280 }
 0x108   :  { %277 = vsyncpa [#allocation3], 1 }
 0x109   :  { %278 = vsyncpa [#allocation6], 1 }
 0x10a   :  { %279 = vsyncpa [#allocation4], 1 }

</bundles_post_ra>
